<compile_context>
chip_gen: v6e
topology: v6e:2x2x1
jax: 0.10.0
libtpu: 0.0.40
codegen_flags: <defaults>
</compile_context>

<pallas_src>
import jax
import jax.numpy as jnp
from jax.experimental import pallas as pl
from jax.experimental.pallas import tpu as pltpu

# ---- module hyper-parameters (mirrors the PyTorch __init__) -----------------
hidden_dim_list = [32, 64, 32]   # global used by the original module
INCLUDE_LABEL = 4                # include_label > 0 -> concat one-hot(y, 4)
NUM_CLASSES = 2
DROPOUT = 0.3                    # TODO(synk): dropout is identity at inference; not applied.

LANE = 128                       # TPU lane width: pad hidden/output widths to this
LAB_PAD = 8                      # one-hot width padded to a sublane multiple


def mlp_kernel(x_ref, y_ref, w0x_ref, w0l_ref, b0_ref,
               w1_ref, b1_ref, w2_ref, b2_ref, o_ref):
    """Fused 3-layer MLP with in-kernel one-hot label 'concat'.

    relu(relu([x, onehot(y)] @ W0 + b0) @ W1 + b1) @ W2 + b2, computed on
    lane-dense 128-wide slabs.  Zero-padded weight/bias columns keep the
    padded output columns exactly zero.
    """
    x = x_ref[...]                                         # (tb, D0) f32
    tb = x.shape[0]

    # one-hot(y) built in-register: (tb, LAB_PAD)
    lab_iota = jax.lax.broadcasted_iota(jnp.int32, (tb, LAB_PAD), 1)
    onehot = (lab_iota == y_ref[...]).astype(jnp.float32)

    h = (jnp.dot(x, w0x_ref[...], preferred_element_type=jnp.float32)
         + jnp.dot(onehot, w0l_ref[...], preferred_element_type=jnp.float32)
         + b0_ref[...])
    h = jnp.maximum(h, 0.0)
    h = jnp.dot(h, w1_ref[...], preferred_element_type=jnp.float32) + b1_ref[...]
    h = jnp.maximum(h, 0.0)
    o_ref[...] = (jnp.dot(h, w2_ref[...], preferred_element_type=jnp.float32)
                  + b2_ref[...]).astype(o_ref.dtype)


def _round_up(a, m):
    return (a + m - 1) // m * m


@jax.jit
def mlp_forward(x, y, params):
    """x: (B, hidden_dim_list[0]) f32, y: (B,) int32 labels in [0, INCLUDE_LABEL)."""
    w0, b0, w1, b1, w2, b2 = params

    B, D0 = x.shape
    H1 = w0.shape[1]
    H2 = w1.shape[1]
    C = w2.shape[1]

    # --- pad/split parameters into lane-dense (128-wide) slabs.  Zero padding
    #     is mathematically inert (padded columns stay exactly zero). --------
    w0x = jnp.zeros((D0, LANE), jnp.float32).at[:, :H1].set(w0[:D0])
    w0l = jnp.zeros((LAB_PAD, LANE), jnp.float32).at[:INCLUDE_LABEL, :H1].set(w0[D0:])
    b0p = jnp.zeros((1, LANE), jnp.float32).at[:, :H1].set(b0)
    w1p = jnp.zeros((LANE, LANE), jnp.float32).at[:H1, :H2].set(w1)
    b1p = jnp.zeros((1, LANE), jnp.float32).at[:, :H2].set(b1)
    w2p = jnp.zeros((LANE, LANE), jnp.float32).at[:H2, :C].set(w2)
    b2p = jnp.zeros((1, LANE), jnp.float32).at[:, :C].set(b2)

    # --- MXU-sized batch tile; pad the batch instead of asserting ----------
    tb = min(_round_up(B, 8), 256)
    B_pad = _round_up(B, tb)
    if B_pad != B:
        x = jnp.pad(x, ((0, B_pad - B), (0, 0)))
        y = jnp.pad(y, ((0, B_pad - B),))
    y2d = y.astype(jnp.int32).reshape(B_pad, 1)

    grid = (B_pad // tb,)
    flops = 2 * B_pad * (D0 * LANE + LAB_PAD * LANE + LANE * LANE + LANE * LANE)
    bytes_accessed = 4 * (x.size + y2d.size + w0x.size + w0l.size
                          + w1p.size + w2p.size + 3 * LANE + B_pad * LANE)

    out = pl.pallas_call(
        mlp_kernel,
        out_shape=jax.ShapeDtypeStruct((B_pad, LANE), jnp.float32),
        grid_spec=pltpu.PrefetchScalarGridSpec(
            num_scalar_prefetch=0,
            grid=grid,
            in_specs=[
                pl.BlockSpec((tb, D0), lambda i: (i, 0)),         # x tile
                pl.BlockSpec((tb, 1), lambda i: (i, 0)),          # y tile
                pl.BlockSpec((D0, LANE), lambda i: (0, 0)),       # W0x (resident)
                pl.BlockSpec((LAB_PAD, LANE), lambda i: (0, 0)),  # W0lab
                pl.BlockSpec((1, LANE), lambda i: (0, 0)),        # b0
                pl.BlockSpec((LANE, LANE), lambda i: (0, 0)),     # W1
                pl.BlockSpec((1, LANE), lambda i: (0, 0)),        # b1
                pl.BlockSpec((LANE, LANE), lambda i: (0, 0)),     # W2
                pl.BlockSpec((1, LANE), lambda i: (0, 0)),        # b2
            ],
            out_specs=pl.BlockSpec((tb, LANE), lambda i: (i, 0)),
        ),
        compiler_params=pltpu.CompilerParams(
            dimension_semantics=("parallel",)),
        cost_estimate=pl.CostEstimate(
            flops=flops, transcendentals=0, bytes_accessed=bytes_accessed),
    )(x, y2d, w0x, w0l, b0p, w1p, b1p, w2p, b2p)

    # Slice lane-dense slab back to (B, num_classes).
    return out[:B, :C]


def init_params(key):
    """Deterministic parameter init. Shapes follow the PyTorch module:
       Linear(hidden_dim_list[0]+include_label, hidden_dim_list[1]),
       Linear(hidden_dim_list[1], hidden_dim_list[2]),
       Linear(hidden_dim_list[2], num_classes)."""
    dims = hidden_dim_list.copy()
    dims[0] += INCLUDE_LABEL
    layer_dims = list(zip(dims[:-1], dims[1:])) + [(dims[-1], NUM_CLASSES)]

    keys = jax.random.split(key, 2 * len(layer_dims))
    params = []
    for li, (din, dout) in enumerate(layer_dims):
        bound = 1.0 / jnp.sqrt(din)
        w = jax.random.uniform(keys[2 * li], (din, dout), jnp.float32, -bound, bound)
        b = jax.random.uniform(keys[2 * li + 1], (1, dout), jnp.float32, -bound, bound)
        params += [w, b]
    return tuple(params)


def reference_forward(x, y, params):
    w0, b0, w1, b1, w2, b2 = params
    if INCLUDE_LABEL > 0:
        x = jnp.concatenate([x, jax.nn.one_hot(y, INCLUDE_LABEL, dtype=x.dtype)], axis=1)
    h = jnp.maximum(x @ w0 + b0, 0.0)
    h = jnp.maximum(h @ w1 + b1, 0.0)
    return h @ w2 + b2


if __name__ == "__main__":
    key = jax.random.PRNGKey(0)
    kx, ky, kp = jax.random.split(key, 3)
    params = init_params(kp)

    # Case 1: nice batch size.
    B = 16
    x = jax.random.normal(kx, (B, hidden_dim_list[0]), jnp.float32)
    y = jax.random.randint(ky, (B,), 0, INCLUDE_LABEL, jnp.int32)
    out = jax.block_until_ready(mlp_forward(x, y, params))
    ref = reference_forward(x, y, params)
    assert out.shape == (B, NUM_CLASSES)
    assert jnp.allclose(out, ref, atol=1e-5, rtol=1e-5)

    # Case 2: batch not a multiple of 8 (exercises the padded-tail path).
    B2 = 10
    x2 = x[:B2]
    y2 = y[:B2]
    out2 = jax.block_until_ready(mlp_forward(x2, y2, params))
    ref2 = reference_forward(x2, y2, params)
    assert out2.shape == (B2, NUM_CLASSES)
    assert jnp.allclose(out2, ref2, atol=1e-5, rtol=1e-5)

    print("KERNEL_OK")
</pallas_src>

<mosaic_0001>
module attributes {stable_mosaic.version = 11 : i64} {
  func.func @mlp_kernel(%arg0: i32, %arg1: memref<16x32xf32, #tpu.memory_space<vmem>>, %arg2: memref<16x1xi32, #tpu.memory_space<vmem>>, %arg3: memref<32x128xf32, #tpu.memory_space<vmem>>, %arg4: memref<8x128xf32, #tpu.memory_space<vmem>>, %arg5: memref<1x128xf32, #tpu.memory_space<vmem>>, %arg6: memref<128x128xf32, #tpu.memory_space<vmem>>, %arg7: memref<1x128xf32, #tpu.memory_space<vmem>>, %arg8: memref<128x128xf32, #tpu.memory_space<vmem>>, %arg9: memref<1x128xf32, #tpu.memory_space<vmem>>, %arg10: memref<16x128xf32, #tpu.memory_space<vmem>>) attributes {dimension_semantics = [#tpu.dimension_semantics<parallel>], iteration_bounds = array<i64: 1>, scalar_prefetch = 0 : i64, scratch_operands = 0 : i64, tpu.core_type = #tpu.core_type<tc>, window_params = [{transform_indices = @transform_0, window_bounds = array<i64: 16, 32>}, {transform_indices = @transform_1, window_bounds = array<i64: 16, 1>}, {pipeline_mode = #tpu.pipeline_mode<synchronous>, transform_indices = @transform_2, window_bounds = array<i64: 32, 128>}, {pipeline_mode = #tpu.pipeline_mode<synchronous>, transform_indices = @transform_3, window_bounds = array<i64: 8, 128>}, {pipeline_mode = #tpu.pipeline_mode<synchronous>, transform_indices = @transform_4, window_bounds = array<i64: 1, 128>}, {pipeline_mode = #tpu.pipeline_mode<synchronous>, transform_indices = @transform_5, window_bounds = array<i64: 128, 128>}, {pipeline_mode = #tpu.pipeline_mode<synchronous>, transform_indices = @transform_6, window_bounds = array<i64: 1, 128>}, {pipeline_mode = #tpu.pipeline_mode<synchronous>, transform_indices = @transform_7, window_bounds = array<i64: 128, 128>}, {pipeline_mode = #tpu.pipeline_mode<synchronous>, transform_indices = @transform_8, window_bounds = array<i64: 1, 128>}, {transform_indices = @transform_9, window_bounds = array<i64: 16, 128>}]} {
    %c0 = arith.constant 0 : index
    %c0_0 = arith.constant 0 : index
    %0 = vector.load %arg1[%c0, %c0_0] : memref<16x32xf32, #tpu.memory_space<vmem>>, vector<16x32xf32>
    %1 = tpu.iota {dimensions = array<i32: 1>} : vector<16x8xi32>
    %c0_1 = arith.constant 0 : index
    %c0_2 = arith.constant 0 : index
    %2 = vector.load %arg2[%c0_1, %c0_2] : memref<16x1xi32, #tpu.memory_space<vmem>>, vector<16x1xi32>
    %3 = vector.broadcast %2 : vector<16x1xi32> to vector<16x8xi32>
    %4 = arith.cmpi eq, %1, %3 : vector<16x8xi32>
    %5 = arith.extui %4 : vector<16x8xi1> to vector<16x8xi32>
    %6 = arith.sitofp %5 : vector<16x8xi32> to vector<16x8xf32>
    %c0_3 = arith.constant 0 : index
    %c0_4 = arith.constant 0 : index
    %7 = vector.load %arg3[%c0_3, %c0_4] : memref<32x128xf32, #tpu.memory_space<vmem>>, vector<32x128xf32>
    %cst = arith.constant dense<0.000000e+00> : vector<16x128xf32>
    %8 = tpu.matmul %0, %7, %cst {dimension_numbers = #tpu.dot_dimension_numbers<[1], [0], [0], [1], [0, 0, 1, 1], [], []>} : vector<16x32xf32>, vector<32x128xf32>, vector<16x128xf32> -> vector<16x128xf32>
    %c0_5 = arith.constant 0 : index
    %c0_6 = arith.constant 0 : index
    %9 = vector.load %arg4[%c0_5, %c0_6] : memref<8x128xf32, #tpu.memory_space<vmem>>, vector<8x128xf32>
    %cst_7 = arith.constant dense<0.000000e+00> : vector<16x128xf32>
    %10 = tpu.matmul %6, %9, %cst_7 {dimension_numbers = #tpu.dot_dimension_numbers<[1], [0], [0], [1], [0, 0, 1, 1], [], []>} : vector<16x8xf32>, vector<8x128xf32>, vector<16x128xf32> -> vector<16x128xf32>
    %11 = arith.addf %8, %10 : vector<16x128xf32>
    %c0_8 = arith.constant 0 : index
    %c0_9 = arith.constant 0 : index
    %12 = vector.load %arg5[%c0_8, %c0_9] : memref<1x128xf32, #tpu.memory_space<vmem>>, vector<1x128xf32>
    %13 = vector.broadcast %12 : vector<1x128xf32> to vector<16x128xf32>
    %14 = arith.addf %11, %13 : vector<16x128xf32>
    %cst_10 = arith.constant 0.000000e+00 : f32
    %15 = vector.broadcast %cst_10 : f32 to vector<16x128xf32>
    %16 = arith.maximumf %14, %15 : vector<16x128xf32>
    %c0_11 = arith.constant 0 : index
    %c0_12 = arith.constant 0 : index
    %17 = vector.load %arg6[%c0_11, %c0_12] : memref<128x128xf32, #tpu.memory_space<vmem>>, vector<128x128xf32>
    %cst_13 = arith.constant dense<0.000000e+00> : vector<16x128xf32>
    %18 = tpu.matmul %16, %17, %cst_13 {dimension_numbers = #tpu.dot_dimension_numbers<[1], [0], [0], [1], [0, 0, 1, 1], [], []>} : vector<16x128xf32>, vector<128x128xf32>, vector<16x128xf32> -> vector<16x128xf32>
    %c0_14 = arith.constant 0 : index
    %c0_15 = arith.constant 0 : index
    %19 = vector.load %arg7[%c0_14, %c0_15] : memref<1x128xf32, #tpu.memory_space<vmem>>, vector<1x128xf32>
    %20 = vector.broadcast %19 : vector<1x128xf32> to vector<16x128xf32>
    %21 = arith.addf %18, %20 : vector<16x128xf32>
    %cst_16 = arith.constant 0.000000e+00 : f32
    %22 = vector.broadcast %cst_16 : f32 to vector<16x128xf32>
    %23 = arith.maximumf %21, %22 : vector<16x128xf32>
    %c0_17 = arith.constant 0 : index
    %c0_18 = arith.constant 0 : index
    %24 = vector.load %arg8[%c0_17, %c0_18] : memref<128x128xf32, #tpu.memory_space<vmem>>, vector<128x128xf32>
    %cst_19 = arith.constant dense<0.000000e+00> : vector<16x128xf32>
    %25 = tpu.matmul %23, %24, %cst_19 {dimension_numbers = #tpu.dot_dimension_numbers<[1], [0], [0], [1], [0, 0, 1, 1], [], []>} : vector<16x128xf32>, vector<128x128xf32>, vector<16x128xf32> -> vector<16x128xf32>
    %c0_20 = arith.constant 0 : index
    %c0_21 = arith.constant 0 : index
    %26 = vector.load %arg9[%c0_20, %c0_21] : memref<1x128xf32, #tpu.memory_space<vmem>>, vector<1x128xf32>
    %27 = vector.broadcast %26 : vector<1x128xf32> to vector<16x128xf32>
    %28 = arith.addf %25, %27 : vector<16x128xf32>
    %c0_22 = arith.constant 0 : index
    %c0_23 = arith.constant 0 : index
    %29 = vector.load %arg10[%c0_22, %c0_23] : memref<16x128xf32, #tpu.memory_space<vmem>>, vector<16x128xf32>
    tpu.vector_store %arg10[%c0_22, %c0_23], %28 {strides = array<i32>} : memref<16x128xf32, #tpu.memory_space<vmem>>, vector<16x128xf32>,
    return
  }
  func.func @transform_0(%arg0: i32) -> (i32, i32) {
    %c0_i32 = arith.constant 0 : i32
    %c0_i32_0 = arith.constant 0 : i32
    return %arg0, %c0_i32 : i32, i32
  }
  func.func @transform_1(%arg0: i32) -> (i32, i32) {
    %c0_i32 = arith.constant 0 : i32
    %c0_i32_0 = arith.constant 0 : i32
    return %arg0, %c0_i32 : i32, i32
  }
  func.func @transform_2(%arg0: i32) -> (i32, i32) {
    %c0_i32 = arith.constant 0 : i32
    %c0_i32_0 = arith.constant 0 : i32
    %c0_i32_1 = arith.constant 0 : i32
    return %c0_i32, %c0_i32_0 : i32, i32
  }
  func.func @transform_3(%arg0: i32) -> (i32, i32) {
    %c0_i32 = arith.constant 0 : i32
    %c0_i32_0 = arith.constant 0 : i32
    %c0_i32_1 = arith.constant 0 : i32
    return %c0_i32, %c0_i32_0 : i32, i32
  }
  func.func @transform_4(%arg0: i32) -> (i32, i32) {
    %c0_i32 = arith.constant 0 : i32
    %c0_i32_0 = arith.constant 0 : i32
    %c0_i32_1 = arith.constant 0 : i32
    return %c0_i32, %c0_i32_0 : i32, i32
  }
  func.func @transform_5(%arg0: i32) -> (i32, i32) {
    %c0_i32 = arith.constant 0 : i32
    %c0_i32_0 = arith.constant 0 : i32
    %c0_i32_1 = arith.constant 0 : i32
    return %c0_i32, %c0_i32_0 : i32, i32
  }
  func.func @transform_6(%arg0: i32) -> (i32, i32) {
    %c0_i32 = arith.constant 0 : i32
    %c0_i32_0 = arith.constant 0 : i32
    %c0_i32_1 = arith.constant 0 : i32
    return %c0_i32, %c0_i32_0 : i32, i32
  }
  func.func @transform_7(%arg0: i32) -> (i32, i32) {
    %c0_i32 = arith.constant 0 : i32
    %c0_i32_0 = arith.constant 0 : i32
    %c0_i32_1 = arith.constant 0 : i32
    return %c0_i32, %c0_i32_0 : i32, i32
  }
  func.func @transform_8(%arg0: i32) -> (i32, i32) {
    %c0_i32 = arith.constant 0 : i32
    %c0_i32_0 = arith.constant 0 : i32
    %c0_i32_1 = arith.constant 0 : i32
    return %c0_i32, %c0_i32_0 : i32, i32
  }
  func.func @transform_9(%arg0: i32) -> (i32, i32) {
    %c0_i32 = arith.constant 0 : i32
    %c0_i32_0 = arith.constant 0 : i32
    return %arg0, %c0_i32 : i32, i32
  }
}

</mosaic_0001>

<bundles_post_ra>
// kernel: mlp_forward.1
= control target key start
LH: loop header
LB: loop body
LE: loop exit
PB: predicated region body
PF: predicated region fallthrough
CT: control target
= control target key end

     0   :  { %v577_v0 = vmov 0   ;;  %vm137_vm0 = vcmask 261120   ;;  %v34_v11 = vlaneseq  ;;  %vm55_vm1 = vcmask 64512   ;;  %s769_s1 = inlined_call_operand.vmem [shape: s32[16,1], index: 1, kind: input, shape index: {}]   ;;  %s770_s2 = inlined_call_operand.vmem [shape: f32[32,128], index: 2, kind: input, shape index: {}]   ;;  %s771_s0 = inlined_call_operand.vmem [shape: f32[16,32], index: 0, kind: input, shape index: {}]   ;;  %s772_s3 = inlined_call_operand.vmem [shape: f32[8,128], index: 3, kind: input, shape index: {}]   ;;  %s773_s5 = inlined_call_operand.vmem [shape: f32[128,128], index: 5, kind: input, shape index: {}]   ;;  %s774_s7 = inlined_call_operand.vmem [shape: f32[128,128], index: 7, kind: input, shape index: {}]   ;;  %s775_s4 = inlined_call_operand.vmem [shape: f32[1,128], index: 4, kind: input, shape index: {}]   ;;  %s776_s6 = inlined_call_operand.vmem [shape: f32[1,128], index: 6, kind: input, shape index: {}]   ;;  %s777_s8 = inlined_call_operand.vmem [shape: f32[1,128], index: 8, kind: input, shape index: {}]   ;;  %s778_s9 = inlined_call_operand.vmem [shape: f32[16,128], index: 9, kind: output, shape index: {}]  }
   0x1   :  { %576 = vset.pattern.permute.xlu0 %v577_v0  ;;  %v36_v1 = vld [vmem:[%s769_s1] sm:$0xff]  ;;  %v53_v2 = vld [vmem:[%s770_s2 + $0x18] sm:$0xff]  ;;  %v37_v3 = vld [vmem:[%s769_s1 + $0x8] sm:$0xff]  ;;  %v578_v14 = vmov 0.0  }
   0x2   :  { %39 = vperm.xlu0 %576, %v36_v1   ;;  %493 = vmatprep.subr.mxu1 %v53_v2  ;;  %v52_v4 = vld [vmem:[%s770_s2 + $0x10] sm:$0xff]  ;;  %v51_v5 = vld [vmem:[%s770_s2 + $0x8] sm:$0xff]  ;;  %v32_v6 = vld [vmem:[%s771_s0] sm:$0xff]  ;;  %v35_v12 = vand.u32 127, %v34_v11 }
   0x3   :  { %494 = vmatpush3.msra.mxu1 %v53_v2  ;;  %v54_v7 = vld [vmem:[%s772_s3] sm:$0xff]  ;;  %501 = vmatprep.mubr.msk.f32.mxu1 %vm137_vm0, %v32_v6  ;;  %v245_v9 = vld [vmem:[%s773_s5 + $0x78] sm:$0xff]  ;;  %v33_v10 = vld [vmem:[%s771_s0 + $0x8] sm:$0xff] }
   0x4   :  { %495 = vmatprep.subr.mxu1 %v52_v4  ;;  %v50_v8 = vld [vmem:[%s770_s2] sm:$0xff]  ;;  %488 = vmatprep.subr.mxu0 %v54_v7  ;;  %v244_v18 = vld [vmem:[%s773_s5 + $0x70] sm:$0xff]  ;;  %v243_v19 = vld [vmem:[%s773_s5 + $0x68] sm:$0xff] }
   0x5   :  { %496 = vmatpush3.msra.mxu1 %v52_v4  ;;  %489 = vmatpush3.msra.mxu0 %v54_v7  ;;  %v242_v20 = vld [vmem:[%s773_s5 + $0x60] sm:$0xff]  ;;  %v241_v21 = vld [vmem:[%s773_s5 + $0x58] sm:$0xff]  ;;  %v240_v22 = vld [vmem:[%s773_s5 + $0x50] sm:$0xff] }
   0x6   :  { %42 = vperm.xlu0 %576, %v37_v3   ;;  %497 = vmatprep.subr.mxu1 %v51_v5  ;;  %v239_v23 = vld [vmem:[%s773_s5 + $0x48] sm:$0xff]  ;;  %v238_v24 = vld [vmem:[%s773_s5 + $0x40] sm:$0xff]  ;;  %v237_v25 = vld [vmem:[%s773_s5 + $0x38] sm:$0xff] }
   0x7   :  { %498 = vmatpush3.msra.mxu1 %v51_v5  ;;  %504 = vmatprep.subr.mxu0 %v245_v9  ;;  %v236_v26 = vld [vmem:[%s773_s5 + $0x30] sm:$0xff]  ;;  %v235_v27 = vld [vmem:[%s773_s5 + $0x28] sm:$0xff]  ;;  %v234_v28 = vld [vmem:[%s773_s5 + $0x20] sm:$0xff] }
   0x8   :  { %499 = vmatprep.subr.mxu1 %v50_v8  ;;  %v233_v29 = vld [vmem:[%s773_s5 + $0x18] sm:$0xff]  ;;  %v232_v30 = vld [vmem:[%s773_s5 + $0x10] sm:$0xff]  ;;  %v231_v31 = vld [vmem:[%s773_s5 + $0x8] sm:$0xff] }
   0x9   :  { %500 = vmatpush3.msra.mxu1 %v50_v8  ;;  %v230_v32 = vld [vmem:[%s773_s5] sm:$0xff]  ;;  %v345_v33 = vld [vmem:[%s774_s7 + $0x78] sm:$0xff]  ;;  %v344_v34 = vld [vmem:[%s774_s7 + $0x70] sm:$0xff] }
   0xa   :  { %502 = vmatmul.mubr.msk.f32.vlgmr.msra.gmra.mxu1 %vm137_vm0, %v33_v10  ;;  %539 = vmatprep.subr.mxu1 %v345_v33  ;;  %v343_v35 = vld [vmem:[%s774_s7 + $0x68] sm:$0xff]  ;;  %v342_v36 = vld [vmem:[%s774_s7 + $0x60] sm:$0xff]  ;;  %v341_v37 = vld [vmem:[%s774_s7 + $0x58] sm:$0xff] }
   0xb   :  { %540 = vmatpush3.msra.mxu1 %v345_v33  ;;  %v340_v38 = vld [vmem:[%s774_s7 + $0x50] sm:$0xff]  ;;  %v339_v39 = vld [vmem:[%s774_s7 + $0x48] sm:$0xff]  ;;  %v338_v40 = vld [vmem:[%s774_s7 + $0x40] sm:$0xff] }
   0xc   :  { %541 = vmatprep.subr.mxu1 %v344_v34  ;;  %v337_v41 = vld [vmem:[%s774_s7 + $0x38] sm:$0xff]  ;;  %v336_v42 = vld [vmem:[%s774_s7 + $0x30] sm:$0xff]  ;;  %v335_v43 = vld [vmem:[%s774_s7 + $0x28] sm:$0xff] }
   0xd   :  { %542 = vmatpush3.msra.mxu1 %v344_v34  ;;  %v334_v44 = vld [vmem:[%s774_s7 + $0x20] sm:$0xff]  ;;  %v333_v56 = vld [vmem:[%s774_s7 + $0x18] sm:$0xff]  ;;  %v332_v57 = vld [vmem:[%s774_s7 + $0x10] sm:$0xff] }
   0xe   :  { %543 = vmatprep.subr.mxu1 %v343_v35  ;;  %v440_v48 = vld [vmem:[%s775_s4] ss:$0 sm:$0xff]  ;;  %v331_v58 = vld [vmem:[%s774_s7 + $0x8] sm:$0xff] }
   0xf   :  { %544 = vmatpush3.msra.mxu1 %v343_v35  ;;  %v330_v59 = vld [vmem:[%s774_s7] sm:$0xff] }
  0x10   :  { %545 = vmatprep.subr.mxu1 %v342_v36  ;;  %v441_v60 = vld [vmem:[%s776_s6] ss:$0 sm:$0xff] }
  0x11   :  { %546 = vmatpush3.msra.mxu1 %v342_v36  ;;  %v442_v3 = vld [vmem:[%s777_s8] ss:$0 sm:$0xff] }
  0x12   :  { %547 = vmatprep.subr.mxu1 %v341_v37 }
  0x13   :  { %548 = vmatpush3.msra.mxu1 %v341_v37 }
  0x14   :  { %549 = vmatprep.subr.mxu1 %v340_v38 }
  0x15   :  { %550 = vmatpush3.msra.mxu1 %v340_v38 }
  0x16   :  { %551 = vmatprep.subr.mxu1 %v339_v39 }
  0x17   :  { %552 = vmatpush3.msra.mxu1 %v339_v39 }
  0x18   :  { %553 = vmatprep.subr.mxu1 %v338_v40 }
  0x19   :  { %554 = vmatpush3.msra.mxu1 %v338_v40 }
  0x1a   :  { %555 = vmatprep.subr.mxu1 %v337_v41 }
  0x1b   :  { %556 = vmatpush3.msra.mxu1 %v337_v41 }
  0x1c   :  { %557 = vmatprep.subr.mxu1 %v336_v42 }
  0x1d   :  { %558 = vmatpush3.msra.mxu1 %v336_v42 }
  0x1e   :  { %559 = vmatprep.subr.mxu1 %v335_v43 }
  0x1f   :  { %560 = vmatpush3.msra.mxu1 %v335_v43 }
  0x20   :  { %561 = vmatprep.subr.mxu1 %v334_v44 }
  0x21   :  { %562 = vmatpush3.msra.mxu1 %v334_v44 }
  0x22   :  { %563 = vmatprep.subr.mxu1 %v333_v56 }
  0x23   :  { %564 = vmatpush3.msra.mxu1 %v333_v56 }
  0x24   :  { %565 = vmatprep.subr.mxu1 %v332_v57 }
  0x25   :  { %566 = vmatpush3.msra.mxu1 %v332_v57 }
  0x26   :  { %567 = vmatprep.subr.mxu1 %v331_v58 }
  0x27   :  { %568 = vmatpush3.msra.mxu1 %v331_v58 }
  0x28   :  { %569 = vmatprep.subr.mxu1 %v330_v59 }
  0x29   :  { %570 = vmatpush3.msra.mxu1 %v330_v59 }
  0x7d   :  { %v40_v13 = vpop.permute.xlu0 %39 }
  0x7e   :  { %vm44_vm2 = vcmp.eq.s32.totalorder %v35_v12, %v40_v13 }
  0x7f   :  { %v434_v15 = vsel %vm44_vm2, 1.0, %v578_v14 }
  0x80   :  { %490 = vmatprep.mubr.msk.f32.mxu0 %vm55_vm1, %v434_v15 }
  0x81   :  { %v43_v16 = vpop.permute.xlu0 %42 }
  0x82   :  { %vm45_vm3 = vcmp.eq.s32.totalorder %v35_v12, %v43_v16 }
  0x83   :  { %v435_v17 = vsel %vm45_vm3, 1.0, %v578_v14 }
  0x84   :  { %491 = vmatmul.mubr.msk.f32.vlgmr.msra.gmra.mxu0 %vm55_vm1, %v435_v17 }
  0x85   :  { %505 = vmatpush3.msra.mxu0 %v245_v9 }
  0x86   :  { %506 = vmatprep.subr.mxu0 %v244_v18 }
  0x87   :  { %507 = vmatpush3.msra.mxu0 %v244_v18 }
  0x88   :  { %508 = vmatprep.subr.mxu0 %v243_v19 }
  0x89   :  { %509 = vmatpush3.msra.mxu0 %v243_v19 }
  0x8a   :  { %510 = vmatprep.subr.mxu0 %v242_v20 }
  0x8b   :  { %511 = vmatpush3.msra.mxu0 %v242_v20 }
  0x8c   :  { %512 = vmatprep.subr.mxu0 %v241_v21 }
  0x8d   :  { %513 = vmatpush3.msra.mxu0 %v241_v21 }
  0x8e   :  { %514 = vmatprep.subr.mxu0 %v240_v22 }
  0x8f   :  { %515 = vmatpush3.msra.mxu0 %v240_v22 }
  0x90   :  { %516 = vmatprep.subr.mxu0 %v239_v23 }
  0x91   :  { %517 = vmatpush3.msra.mxu0 %v239_v23 }
  0x92   :  { %518 = vmatprep.subr.mxu0 %v238_v24 }
  0x93   :  { %519 = vmatpush3.msra.mxu0 %v238_v24 }
  0x94   :  { %520 = vmatprep.subr.mxu0 %v237_v25 }
  0x95   :  { %521 = vmatpush3.msra.mxu0 %v237_v25 }
  0x96   :  { %522 = vmatprep.subr.mxu0 %v236_v26 }
  0x97   :  { %523 = vmatpush3.msra.mxu0 %v236_v26 }
  0x98   :  { %524 = vmatprep.subr.mxu0 %v235_v27 }
  0x99   :  { %525 = vmatpush3.msra.mxu0 %v235_v27 }
  0x9a   :  { %526 = vmatprep.subr.mxu0 %v234_v28 }
  0x9b   :  { %527 = vmatpush3.msra.mxu0 %v234_v28 }
  0x9c   :  { %528 = vmatprep.subr.mxu0 %v233_v29 }
  0x9d   :  { %529 = vmatpush3.msra.mxu0 %v233_v29 }
  0x9e   :  { %530 = vmatprep.subr.mxu0 %v232_v30 }
  0x9f   :  { %531 = vmatpush3.msra.mxu0 %v232_v30 }
  0xa0   :  { %532 = vmatprep.subr.mxu0 %v231_v31 }
  0xa1   :  { %533 = vmatpush3.msra.mxu0 %v231_v31 }
  0xa2   :  { %534 = vmatprep.subr.mxu0 %v230_v32 }
  0xa3   :  { %535 = vmatpush3.msra.mxu0 %v230_v32 }
  0xca   :  { %v503_v45 = vpop.f32.mrf.mxu1 }
  0xcc   :  { %v210_v49 = vpop.f32.mrf.mxu1 }
 0x144   :  { %v492_v46 = vpop.f32.mrf.mxu0 }
 0x145   :  { %v216_v47 = vadd.f32 %v503_v45, %v492_v46 }
 0x146   :  { %v128_v50 = vpop.f32.mrf.mxu0 }
 0x147   :  { %v211_v51 = vadd.f32 %v210_v49, %v128_v50  ;;  %v227_v52 = vadd.f32 %v440_v48, %v216_v47 }
 0x149   :  { %v226_v53 = vadd.f32 %v440_v48, %v211_v51  ;;  %v229_v55 = vmax.f32 %v227_v52, 0.0 }
 0x14b   :  { %v228_v54 = vmax.f32 %v226_v53, 0.0 }
 0x14d   :  { %536 = vmatprep.mubr.f32.mxu0 %v228_v54 }
 0x14e   :  { %537 = vmatmul.mubr.f32.vlgmr.msra.gmra.mxu0 %v229_v55 }
 0x20e   :  { %v538_v61 = vpop.f32.mrf.mxu0 }
 0x20f   :  { %v325_v62 = vadd.f32 %v538_v61, %v441_v60 }
 0x210   :  { %v319_v63 = vpop.f32.mrf.mxu0 }
 0x211   :  { %v320_v0 = vadd.f32 %v441_v60, %v319_v63  ;;  %v329_v2 = vmax.f32 %v325_v62, 0.0 }
 0x213   :  { %v328_v1 = vmax.f32 %v320_v0, 0.0 }
 0x215   :  { %571 = vmatprep.mubr.f32.mxu1 %v328_v1 }
 0x216   :  { %572 = vmatmul.mubr.f32.vlgmr.msra.gmra.mxu1 %v329_v2 }
 0x2d6   :  { %v573_v4 = vpop.f32.mrf.mxu1 }
 0x2d7   :  { %v425_v5 = vadd.f32 %v573_v4, %v442_v3 }
 0x2d8   :  { %v419_v6 = vpop.f32.mrf.mxu1 }
 0x2d9   :  { %429 = vst [vmem:[%s778_s9 + $0x8] sm:$0xff] %v425_v5  ;;  %v420_v7 = vadd.f32 %v442_v3, %v419_v6 }
 0x2db   :  { %428 = vst [vmem:[%s778_s9] sm:$0xff] %v420_v7 }

</bundles_post_ra>
